<compile_context>
chip_gen: v7x
topology: tpu7x:2x2x1
jax: 0.10.0
libtpu: 0.0.40
codegen_flags: <defaults>
</compile_context>

<pallas_src>
import jax
import jax.numpy as jnp
from jax import lax
from jax.experimental import pallas as pl
from jax.experimental.pallas import tpu as pltpu


def _round_up(v, m):
    return ((v + m - 1) // m) * m


def actor_kernel(x_ref, w1_ref, b1_ref, w2_ref, b2_ref, w3_ref, b3_ref, o_ref):
    # x_ref: (TB, 8) bf16 -- batch rows exactly as stored by the caller.
    x = x_ref[...]                                               # (TB, 8) bf16

    # h1 = W1 @ x^T without any data transpose: contract feature axes directly.
    w1 = w1_ref[...].astype(jnp.bfloat16)                        # (32, 8)
    h1 = lax.dot_general(w1, x, (((1,), (1,)), ((), ())),
                         preferred_element_type=jnp.float32)     # (32, TB) f32
    h1 = jnp.maximum(h1 + b1_ref[...], 0.0)

    h2 = jnp.dot(w2_ref[...], h1,
                 preferred_element_type=jnp.float32)             # (16, TB)
    h2 = jnp.maximum(h2 + b2_ref[...], 0.0)

    logits = jnp.dot(w3_ref[...], h2,
                     preferred_element_type=jnp.float32) + b3_ref[...]   # (4, TB)

    # Softmax over the 4 class rows (sublane axis), exact f32 normalization.
    m = jnp.max(logits, axis=0, keepdims=True)                   # (1, TB)
    e = jnp.exp(logits - m)                                      # (4, TB)
    denom = jnp.sum(e, axis=0, keepdims=True)                    # (1, TB)
    o_ref[...] = (e / denom).astype(o_ref.dtype)                 # lane-dense store


def actor_forward(x, params, *, block_b=32768, batch_major_output=True):
    """x: (B, 8) float32 -> (B, 4) softmax probabilities (float32).

    params: dict with w1 (32,8), b1 (32,1), w2 (16,32), b2 (16,1),
                      w3 (4,16),  b3 (4,1)   (PyTorch (out, in) layout).
    Callers that can consume class-major (4, B) output should pass
    batch_major_output=False to skip the final (tiny) transpose.
    Note: block_b beyond ~64K lanes needs vmem_limit_bytes raised accordingly.
    """
    B = x.shape[0]

    # Input is streamed as bf16 (halves HBM bytes); no materialized transpose.
    xb = x.astype(jnp.bfloat16)

    # Batch tiling: lane-aligned tiles of <= block_b, split into >=2 grid steps
    # for large batches so both v7x TensorCores get work.
    b128 = _round_up(max(B, 1), 128)
    n_tiles = pl.cdiv(b128, block_b)
    if n_tiles == 1 and b128 >= 8192:
        n_tiles = 2
    tb = _round_up(pl.cdiv(b128, n_tiles), 128)
    pad_b = _round_up(b128, tb)
    if pad_b != B:
        xb = jnp.pad(xb, ((0, pad_b - B), (0, 0)))

    grid = (pad_b // tb,)
    const = lambda i: (0, 0)   # weights/biases resident across the batch grid

    out = pl.pallas_call(
        actor_kernel,
        out_shape=jax.ShapeDtypeStruct((4, pad_b), jnp.float32),
        grid=grid,
        in_specs=[
            pl.BlockSpec((tb, 8), lambda i: (i, 0)),     # x  (TB, 8) bf16
            pl.BlockSpec((32, 8), const),                # w1
            pl.BlockSpec((32, 1), const),                # b1
            pl.BlockSpec((16, 32), const),               # w2
            pl.BlockSpec((16, 1), const),                # b2
            pl.BlockSpec((4, 16), const),                # w3
            pl.BlockSpec((4, 1), const),                 # b3
        ],
        out_specs=pl.BlockSpec((4, tb), lambda i: (0, i)),
        compiler_params=pltpu.CompilerParams(
            dimension_semantics=("parallel",),
            vmem_limit_bytes=32 * 1024 * 1024),
    )(xb, params["w1"], params["b1"], params["w2"], params["b2"],
      params["w3"], params["b3"])

    out = out[:, :B]                         # drop batch padding, (4, B)
    return out.T if batch_major_output else out


def init_params(key):
    """Deterministic init mimicking nn.Linear's uniform(-1/sqrt(fan_in), +).

    Weights stored PyTorch-style as (out_features, in_features); biases as
    (out_features, 1) columns for sublane broadcasting in the (feat, batch)
    compute layout.
    """
    def linear(key, fan_in, fan_out):
        kw, kb = jax.random.split(key)
        bound = 1.0 / jnp.sqrt(jnp.float32(fan_in))
        w = jax.random.uniform(kw, (fan_out, fan_in), jnp.float32, -bound, bound)
        b = jax.random.uniform(kb, (fan_out, 1), jnp.float32, -bound, bound)
        return w, b

    k1, k2, k3 = jax.random.split(key, 3)
    w1, b1 = linear(k1, 8, 32)
    w2, b2 = linear(k2, 32, 16)
    w3, b3 = linear(k3, 16, 4)
    return {"w1": w1, "b1": b1, "w2": w2, "b2": b2, "w3": w3, "b3": b3}


def ref_forward(x, p):
    """Pure-JAX f32 reference matching the PyTorch module."""
    h1 = jnp.maximum(x @ p["w1"].T + p["b1"].T, 0.0)
    h2 = jnp.maximum(h1 @ p["w2"].T + p["b2"].T, 0.0)
    logits = h2 @ p["w3"].T + p["b3"].T
    return jax.nn.softmax(logits, axis=-1)


if __name__ == "__main__":
    key = jax.random.PRNGKey(0)
    kp, kx1, kx2 = jax.random.split(key, 3)

    params = init_params(kp)

    # Small example consistent with the module: batch=2, in_features=8.
    x = jax.random.normal(kx1, (2, 8), jnp.float32)
    out = jax.block_until_ready(actor_forward(x, params))
    expected = ref_forward(x, params)
    assert out.shape == (2, 4)
    # Exact f32 normalization inside the kernel -> rows sum to 1 to f32 rounding.
    assert bool(jnp.allclose(jnp.sum(out, axis=-1), 1.0, atol=1e-5))
    # bf16 input / first-layer weights vs. pure-f32 reference -> loose-ish atol.
    assert bool(jnp.allclose(out, expected, atol=2e-2))

    # Exercise the multi-block grid + batch padding path (grid=3, TB=128).
    xb = jax.random.normal(kx2, (260, 8), jnp.float32)
    outb = jax.block_until_ready(actor_forward(xb, params, block_b=128))
    expectedb = ref_forward(xb, params)
    assert outb.shape == (260, 4)
    assert bool(jnp.allclose(jnp.sum(outb, axis=-1), 1.0, atol=1e-5))
    assert bool(jnp.allclose(outb, expectedb, atol=2e-2))

    print("KERNEL_OK")
</pallas_src>

<mosaic_0001>
module attributes {stable_mosaic.version = 11 : i64} {
  func.func @actor_kernel(%arg0: i32, %arg1: memref<128x8xbf16, #tpu.memory_space<vmem>>, %arg2: memref<32x8xf32, #tpu.memory_space<vmem>>, %arg3: memref<32x1xf32, #tpu.memory_space<vmem>>, %arg4: memref<16x32xf32, #tpu.memory_space<vmem>>, %arg5: memref<16x1xf32, #tpu.memory_space<vmem>>, %arg6: memref<4x16xf32, #tpu.memory_space<vmem>>, %arg7: memref<4x1xf32, #tpu.memory_space<vmem>>, %arg8: memref<4x128xf32, #tpu.memory_space<vmem>>) attributes {dimension_semantics = [#tpu.dimension_semantics<parallel>], iteration_bounds = array<i64: 1>, scalar_prefetch = 0 : i64, scratch_operands = 0 : i64, tpu.core_type = #tpu.core_type<tc>, window_params = [{transform_indices = @transform_0, window_bounds = array<i64: 128, 8>}, {pipeline_mode = #tpu.pipeline_mode<synchronous>, transform_indices = @transform_1, window_bounds = array<i64: 32, 8>}, {pipeline_mode = #tpu.pipeline_mode<synchronous>, transform_indices = @transform_2, window_bounds = array<i64: 32, 1>}, {pipeline_mode = #tpu.pipeline_mode<synchronous>, transform_indices = @transform_3, window_bounds = array<i64: 16, 32>}, {pipeline_mode = #tpu.pipeline_mode<synchronous>, transform_indices = @transform_4, window_bounds = array<i64: 16, 1>}, {pipeline_mode = #tpu.pipeline_mode<synchronous>, transform_indices = @transform_5, window_bounds = array<i64: 4, 16>}, {pipeline_mode = #tpu.pipeline_mode<synchronous>, transform_indices = @transform_6, window_bounds = array<i64: 4, 1>}, {transform_indices = @transform_7, window_bounds = array<i64: 4, 128>}]} {
    %c0 = arith.constant 0 : index
    %c0_0 = arith.constant 0 : index
    %0 = vector.load %arg1[%c0, %c0_0] : memref<128x8xbf16, #tpu.memory_space<vmem>>, vector<128x8xbf16>
    %c0_1 = arith.constant 0 : index
    %c0_2 = arith.constant 0 : index
    %1 = vector.load %arg2[%c0_1, %c0_2] : memref<32x8xf32, #tpu.memory_space<vmem>>, vector<32x8xf32>
    %2 = arith.truncf %1 : vector<32x8xf32> to vector<32x8xbf16>
    %cst = arith.constant dense<0.000000e+00> : vector<32x128xf32>
    %3 = tpu.matmul %2, %0, %cst {dimension_numbers = #tpu.dot_dimension_numbers<[1], [1], [0], [0], [0, 0, 1, 0], [], []>} : vector<32x8xbf16>, vector<128x8xbf16>, vector<32x128xf32> -> vector<32x128xf32>
    %c0_3 = arith.constant 0 : index
    %c0_4 = arith.constant 0 : index
    %4 = vector.load %arg3[%c0_3, %c0_4] : memref<32x1xf32, #tpu.memory_space<vmem>>, vector<32x1xf32>
    %5 = vector.broadcast %4 : vector<32x1xf32> to vector<32x128xf32>
    %6 = arith.addf %3, %5 : vector<32x128xf32>
    %cst_5 = arith.constant 0.000000e+00 : f32
    %7 = vector.broadcast %cst_5 : f32 to vector<32x128xf32>
    %8 = arith.maximumf %6, %7 : vector<32x128xf32>
    %c0_6 = arith.constant 0 : index
    %c0_7 = arith.constant 0 : index
    %9 = vector.load %arg4[%c0_6, %c0_7] : memref<16x32xf32, #tpu.memory_space<vmem>>, vector<16x32xf32>
    %cst_8 = arith.constant dense<0.000000e+00> : vector<16x128xf32>
    %10 = tpu.matmul %9, %8, %cst_8 {dimension_numbers = #tpu.dot_dimension_numbers<[1], [0], [0], [1], [0, 0, 1, 1], [], []>} : vector<16x32xf32>, vector<32x128xf32>, vector<16x128xf32> -> vector<16x128xf32>
    %c0_9 = arith.constant 0 : index
    %c0_10 = arith.constant 0 : index
    %11 = vector.load %arg5[%c0_9, %c0_10] : memref<16x1xf32, #tpu.memory_space<vmem>>, vector<16x1xf32>
    %12 = vector.broadcast %11 : vector<16x1xf32> to vector<16x128xf32>
    %13 = arith.addf %10, %12 : vector<16x128xf32>
    %cst_11 = arith.constant 0.000000e+00 : f32
    %14 = vector.broadcast %cst_11 : f32 to vector<16x128xf32>
    %15 = arith.maximumf %13, %14 : vector<16x128xf32>
    %c0_12 = arith.constant 0 : index
    %c0_13 = arith.constant 0 : index
    %16 = vector.load %arg6[%c0_12, %c0_13] : memref<4x16xf32, #tpu.memory_space<vmem>>, vector<4x16xf32>
    %cst_14 = arith.constant dense<0.000000e+00> : vector<4x128xf32>
    %17 = tpu.matmul %16, %15, %cst_14 {dimension_numbers = #tpu.dot_dimension_numbers<[1], [0], [0], [1], [0, 0, 1, 1], [], []>} : vector<4x16xf32>, vector<16x128xf32>, vector<4x128xf32> -> vector<4x128xf32>
    %c0_15 = arith.constant 0 : index
    %c0_16 = arith.constant 0 : index
    %18 = vector.load %arg7[%c0_15, %c0_16] : memref<4x1xf32, #tpu.memory_space<vmem>>, vector<4x1xf32>
    %19 = vector.broadcast %18 : vector<4x1xf32> to vector<4x128xf32>
    %20 = arith.addf %17, %19 : vector<4x128xf32>
    %cst_17 = arith.constant dense<0xFF800000> : vector<128xf32>
    %21 = vector.multi_reduction <maximumf>, %20, %cst_17 [0] : vector<4x128xf32> to vector<128xf32>
    %22 = vector.shape_cast %21 : vector<128xf32> to vector<1x128xf32>
    %23 = vector.broadcast %22 : vector<1x128xf32> to vector<4x128xf32>
    %24 = arith.subf %20, %23 : vector<4x128xf32>
    %25 = math.exp %24 : vector<4x128xf32>
    %cst_18 = arith.constant dense<0.000000e+00> : vector<128xf32>
    %26 = vector.multi_reduction <add>, %25, %cst_18 [0] : vector<4x128xf32> to vector<128xf32>
    %27 = vector.shape_cast %26 : vector<128xf32> to vector<1x128xf32>
    %28 = vector.broadcast %27 : vector<1x128xf32> to vector<4x128xf32>
    %29 = arith.divf %25, %28 : vector<4x128xf32>
    %c0_19 = arith.constant 0 : index
    %c0_20 = arith.constant 0 : index
    %30 = vector.load %arg8[%c0_19, %c0_20] : memref<4x128xf32, #tpu.memory_space<vmem>>, vector<4x128xf32>
    tpu.vector_store %arg8[%c0_19, %c0_20], %29 {strides = array<i32>} : memref<4x128xf32, #tpu.memory_space<vmem>>, vector<4x128xf32>,
    return
  }
  func.func @transform_0(%arg0: i32) -> (i32, i32) {
    %c0_i32 = arith.constant 0 : i32
    %c0_i32_0 = arith.constant 0 : i32
    return %arg0, %c0_i32 : i32, i32
  }
  func.func @transform_1(%arg0: i32) -> (i32, i32) {
    %c0_i32 = arith.constant 0 : i32
    %c0_i32_0 = arith.constant 0 : i32
    %c0_i32_1 = arith.constant 0 : i32
    return %c0_i32, %c0_i32_0 : i32, i32
  }
  func.func @transform_2(%arg0: i32) -> (i32, i32) {
    %c0_i32 = arith.constant 0 : i32
    %c0_i32_0 = arith.constant 0 : i32
    %c0_i32_1 = arith.constant 0 : i32
    return %c0_i32, %c0_i32_0 : i32, i32
  }
  func.func @transform_3(%arg0: i32) -> (i32, i32) {
    %c0_i32 = arith.constant 0 : i32
    %c0_i32_0 = arith.constant 0 : i32
    %c0_i32_1 = arith.constant 0 : i32
    return %c0_i32, %c0_i32_0 : i32, i32
  }
  func.func @transform_4(%arg0: i32) -> (i32, i32) {
    %c0_i32 = arith.constant 0 : i32
    %c0_i32_0 = arith.constant 0 : i32
    %c0_i32_1 = arith.constant 0 : i32
    return %c0_i32, %c0_i32_0 : i32, i32
  }
  func.func @transform_5(%arg0: i32) -> (i32, i32) {
    %c0_i32 = arith.constant 0 : i32
    %c0_i32_0 = arith.constant 0 : i32
    %c0_i32_1 = arith.constant 0 : i32
    return %c0_i32, %c0_i32_0 : i32, i32
  }
  func.func @transform_6(%arg0: i32) -> (i32, i32) {
    %c0_i32 = arith.constant 0 : i32
    %c0_i32_0 = arith.constant 0 : i32
    %c0_i32_1 = arith.constant 0 : i32
    return %c0_i32, %c0_i32_0 : i32, i32
  }
  func.func @transform_7(%arg0: i32) -> (i32, i32) {
    %c0_i32 = arith.constant 0 : i32
    %c0_i32_0 = arith.constant 0 : i32
    return %c0_i32, %arg0 : i32, i32
  }
}

</mosaic_0001>

<bundles_post_ra>
// kernel: tpu_custom_call.1
= control target key start
LH: loop header
LB: loop body
LE: loop exit
PB: predicated region body
PF: predicated region fallthrough
CT: control target
= control target key end

     0   :  { %vm114_vm0 = vcmask 64512   ;;  %v544_v3 = vmov 0   ;;  %s687_s0 = inlined_call_operand.vmem [shape: bf16[128,8], index: 0, kind: input, shape index: {}]   ;;  %s688_s1 = inlined_call_operand.vmem [shape: f32[32,8], index: 1, kind: input, shape index: {}]   ;;  %s689_s2 = inlined_call_operand.vmem [shape: f32[32,1], index: 2, kind: input, shape index: {}]   ;;  %s690_s3 = inlined_call_operand.vmem [shape: f32[16,32], index: 3, kind: input, shape index: {}]   ;;  %s691_s4 = inlined_call_operand.vmem [shape: f32[16,1], index: 4, kind: input, shape index: {}]   ;;  %s692_s5 = inlined_call_operand.vmem [shape: f32[4,16], index: 5, kind: input, shape index: {}]   ;;  %s693_s6 = inlined_call_operand.vmem [shape: f32[4,1], index: 6, kind: input, shape index: {}]   ;;  %s694_s7 = inlined_call_operand.hbm [shape: f32[4,128], index: 7, kind: output, shape index: {}]  }
   0x1   :  { %v508_v0 = vld [vmem:[%s687_s0] sm:$0xff]   ;;  %v509_v1 = vld [vmem:[%s687_s0 + $0x8] sm:$0xff]   ;;  %506 = vset.pattern.permute.xlu0 %v544_v3  ;;  %507 = vset.pattern.permute.xlu1 %v544_v3  ;;  %v510_v5 = vld [vmem:[%s687_s0 + $0x10] sm:$0xff]  }
   0x2   :  { %493 = vmatprep.subr.msk.bf16.mxu0 %vm114_vm0, %v508_v0  ;;  %v122_v2 = vsel %vm114_vm0, %v508_v0, 0  ;;  %v125_v4 = vsel %vm114_vm0, %v509_v1, 0  ;;  %v44_v6 = vld [vmem:[%s688_s1] sm:$0xff]  ;;  %v45_v7 = vld [vmem:[%s688_s1 + $0x8] sm:$0xff]  ;;  %v52_v10 = vld [vmem:[%s689_s2 + $0x10] sm:$0xff] }
   0x3   :  { %445 = vmatpush3.bf16.xpose.msra.mxu0 %v122_v2  ;;  %v48_v8 = vpack.c.bf16 %v45_v7, %v44_v6  ;;  %v50_v9 = vld [vmem:[%s689_s2] sm:$0xff]  ;;  %v51_v11 = vld [vmem:[%s689_s2 + $0x8] sm:$0xff] }
   0x4   :  { %494 = vmatprep.subr.msk.bf16.mxu0 %vm114_vm0, %v509_v1  ;;  %56 = vperm.xlu0 %506, %v50_v9  }
   0x5   :  { %460 = vmatprep.mubr.msk.bf16.mxu0 %vm114_vm0, %v48_v8 }
   0xb   :  { %447 = vmatpush3.bf16.xpose.msra.mxu0 %v125_v4 }
   0xc   :  { %12 = vsyncpa [#allocation3], 0  ;;  %495 = vmatprep.subr.msk.bf16.mxu0 %vm114_vm0, %v510_v5  ;;  %66 = vperm.xlu1 %507, %v52_v10   ;;  %v53_v12 = vld [vmem:[%s689_s2 + $0x18] sm:$0xff]  ;;  %v200_v13 = vld [vmem:[%s691_s4] sm:$0xff]  ;;  %v128_v14 = vsel %vm114_vm0, %v510_v5, 0  ;;  %vm212_vm1 = vcmask 261120  }
   0xd   :  { %61 = vperm.xlu0 %506, %v51_v11   ;;  %v511_v15 = vld [vmem:[%s687_s0 + $0x18] sm:$0xff]   ;;  %v201_v16 = vld [vmem:[%s691_s4 + $0x8] sm:$0xff]  ;;  %v297_v17 = vld [vmem:[%s693_s6] sm:$0xf]  ;;  %v545_v50 = vmov 0.0|0.0   ;;  %vm546_vm2 = vmmov 0  }
   0xe   :  { %v131_v18 = vsel %vm114_vm0, %v511_v15, 0  ;;  %v512_v19 = vld [vmem:[%s687_s0 + $0x20] sm:$0xff]   ;;  %v513_v21 = vld [vmem:[%s687_s0 + $0x28] sm:$0xff]   ;;  %v514_v23 = vld [vmem:[%s687_s0 + $0x30] sm:$0xff]   ;;  %v547_v51 = vmov 0.0   ;;  %vm303_vm3 = vcmask 130048  }
   0xf   :  { %v134_v20 = vsel %vm114_vm0, %v512_v19, 0  ;;  %v137_v22 = vsel %vm114_vm0, %v513_v21, 0  ;;  %v140_v24 = vsel %vm114_vm0, %v514_v23, 0  ;;  %v515_v25 = vld [vmem:[%s687_s0 + $0x38] sm:$0xff]   ;;  %v46_v27 = vld [vmem:[%s688_s1 + $0x10] sm:$0xff]  ;;  %v198_v30 = vld [vmem:[%s690_s3] sm:$0xff] }
  0x10   :  { %71 = vperm.xlu1 %507, %v53_v12   ;;  %v143_v26 = vsel %vm114_vm0, %v515_v25, 0  ;;  %v47_v28 = vld [vmem:[%s688_s1 + $0x18] sm:$0xff]  ;;  %472 = vmatprep.mubr.msk.f32.mxu1 %vm212_vm1, %v198_v30  ;;  %v199_v49 = vld [vmem:[%s690_s3 + $0x8] sm:$0xff]  ;;  %v296_v61 = vld [vmem:[%s692_s5] sm:$0xf]  ;;  %vm377_vm4 = vcmask 1043456  }
  0x11   :  { %204 = vperm.xlu0 %506, %v200_v13   ;;  %v49_v29 = vpack.c.bf16 %v47_v28, %v46_v27  ;;  %s548_s3 = smov [#allocation2]  }
  0x12   :  { %s404_s5 = sshll.u32 %s548_s3, 4  ;;  %s405_s5 = int_to_ptr.vmem [resolvable:$true] %s404_s5 }
  0x13   :  { %449 = vmatpush3.bf16.xpose.msra.mxu0 %v128_v14  ;;  %s520_s17 = scalar_lea.vmem %s405_s5, 64  ;;  %p525_p1 = scmp.lt.s32.totalorder %s405_s5, %s405_s5 }
  0x14   :  { %496 = vmatprep.subr.msk.bf16.mxu0 %vm114_vm0, %v511_v15  ;;  %209 = vperm.xlu1 %507, %v201_v16   ;;  %p521_p0 = scmp.ne.s32.totalorder %s405_s5, %s520_s17  ;;  %p526_p2 = scmp.lt.s32.totalorder %s520_s17, %s520_s17 }
  0x15   :  { %300 = vperm.xlu0 %506, %v297_v17  }
  0x16   :  { %p527_p3 = por %p526_p2, %p525_p1 }
  0x18   :  { %p528_p4 = pnand %p527_p3, %p521_p0 }
  0x1b   :  { %451 = vmatpush3.bf16.xpose.msra.mxu0 %v131_v18 }
  0x1c   :  { %497 = vmatprep.subr.msk.bf16.mxu0 %vm114_vm0, %v512_v19 }
  0x23   :  { %453 = vmatpush3.bf16.xpose.msra.mxu0 %v134_v20 }
  0x24   :  { %498 = vmatprep.subr.msk.bf16.mxu0 %vm114_vm0, %v513_v21 }
  0x2b   :  { %455 = vmatpush3.bf16.xpose.msra.mxu0 %v137_v22 }
  0x2c   :  { %499 = vmatprep.subr.msk.bf16.mxu0 %vm114_vm0, %v514_v23 }
  0x33   :  { %457 = vmatpush3.bf16.xpose.msra.mxu0 %v140_v24 }
  0x34   :  { %500 = vmatprep.subr.msk.bf16.mxu0 %vm114_vm0, %v515_v25 }
  0x3b   :  { %459 = vmatpush3.bf16.xpose.msra.mxu0 %v143_v26 }
  0x42   :  { %461 = vmatmul.mubr.msk.bf16.vlgmr.msra.gmra.mrb[0].mxu0 %vm114_vm0, %v49_v29 }
  0x83   :  { %v57_v32 = vpop.permute.xlu0 %56 }
  0x8b   :  { %v67_v31 = vpop.permute.xlu1 %66 }
  0x8c   :  { %v62_v39 = vpop.permute.xlu0 %61 }
  0x8f   :  { %v72_v36 = vpop.permute.xlu1 %71 }
  0x90   :  { %v205_v54 = vpop.permute.xlu0 %204 }
  0x93   :  { %v210_v52 = vpop.permute.xlu1 %209 }
  0x94   :  { %v301_v62 = vpop.permute.xlu0 %300 }
 0x115   :  { %v462_v33 = vpop.f32.mrb[0].mxu0 }
 0x116   :  { %v188_v34 = vadd.f32 %v462_v33, %v67_v31  ;;  %v179_v35 = vpop.f32.mrb[1].mxu0 }
 0x117   :  { %v180_v37 = vadd.f32 %v179_v35, %v57_v32  ;;  %v463_v38 = vpop.f32.mrb[2].mxu0 }
 0x118   :  { %v191_v40 = vadd.f32 %v463_v38, %v72_v36  ;;  %v182_v41 = vpop.f32.mrb[3].mxu0  ;;  %v196_v43 = vmax.f32 %v188_v34, 0.0 }
 0x119   :  { %v183_v42 = vadd.f32 %v182_v41, %v62_v39  ;;  %v194_v45 = vmax.f32 %v180_v37, 0.0 }
 0x11a   :  { %v197_v44 = vmax.f32 %v191_v40, 0.0 }
 0x11b   :  { %v195_v46 = vmax.f32 %v183_v42, 0.0 }
 0x11c   :  { %v486_v47 = vpack.c.bf16 %v197_v44, %v196_v43 }
 0x11d   :  { %v482_v48 = vpack.c.bf16 %v195_v46, %v194_v45 }
 0x11f   :  { %483 = vmatprep.subr.bf16.mxu1 %v482_v48 }
 0x120   :  { %485 = vmatpush3.bf16.msra.mxu1 %v482_v48 }
 0x121   :  { %487 = vmatprep.subr.bf16.mxu1 %v486_v47 }
 0x124   :  { %489 = vmatpush3.bf16.msra.mxu1 %v486_v47 }
 0x125   :  { %490 = vmatprep.subr.bf16.mxu1 %v545_v50 }
 0x127   :  { %473 = vmatmul.mubr.msk.f32.vlgmr.msra.gmra.mrb[0].mxu1 %vm212_vm1, %v199_v49 }
 0x128   :  { %479 = vmatprep.mubr.msk.f32.mxu1 %vm546_vm2, %v547_v51 }
 0x1fa   :  { %v474_v53 = vpop.f32.mrb[0].mxu1 }
 0x1fb   :  { %v291_v55 = vadd.f32 %v474_v53, %v210_v52  ;;  %v285_v56 = vpop.f32.mrb[1].mxu1 }
 0x1fc   :  { %v286_v57 = vadd.f32 %v285_v56, %v205_v54 }
 0x1fd   :  { %v295_v58 = vmax.f32 %v291_v55, 0.0 }
 0x1fe   :  { %v294_v59 = vmax.f32 %v286_v57, 0.0 }
 0x200   :  { %v491_v60 = vpack.c.bf16 %v295_v58, %v294_v59 }
 0x202   :  { %492 = vmatpush3.bf16.msra.mxu1 %v491_v60 }
 0x205   :  { %480 = vmatmul.mubr.msk.f32.vlgmr.msra.gmra.mrb[2].mxu1 %vm303_vm3, %v296_v61 }
 0x2d8   :  { %v373_v63 = vpop.f32.mrb[2].mxu1 }
 0x2d9   :  { %v374_v0 = vadd.f32 %v373_v63, %v301_v62  ;;  %v481_v1 = vpop.f32.mrb[3].mxu1 }
 0x2db   :  { %v378_v2 = vsel %vm377_vm4, %v374_v0, -inf }
 0x2dc   :  { %v379_v3 = vrot.slane %v378_v2, 4 }
 0x2de   :  { %v380_v4 = vmax.f32 %v378_v2, %v379_v3 }
 0x2e0   :  { %v381_v5 = vrot.slane %v380_v4, 2 }
 0x2e2   :  { %v382_v6 = vmax.f32 %v380_v4, %v381_v5 }
 0x2e4   :  { %v383_v7 = vrot.slane %v382_v6, 1 }
 0x2e6   :  { %v384_v8 = vmax.f32 %v382_v6, %v383_v7 }
 0x2e8   :  { %v385_v9 = vsub.f32 %v374_v0, %v384_v8 }
 0x2ea   :  { %v386_v10 = vmul.f32 1.442695, %v385_v9 }
 0x2ec   :  { %516 = vpow2.f32 %v386_v10 }
 0x2f6   :  { %v517_v11 = vpop.eup %516 }
 0x2f7   :  { %v388_v12 = vsel %vm377_vm4, %v517_v11, 0.0 }
 0x2f8   :  { %v389_v13 = vrot.slane %v388_v12, 4 }
 0x2fa   :  { %v390_v14 = vadd.f32 %v389_v13, %v388_v12 }
 0x2fc   :  { %v391_v15 = vrot.slane %v390_v14, 2 }
 0x2fe   :  { %v392_v16 = vadd.f32 %v391_v15, %v390_v14 }
 0x300   :  { %v393_v17 = vrot.slane %v392_v16, 1 }
 0x302   :  { %v394_v18 = vadd.f32 %v393_v17, %v392_v16 }
 0x304   :  { %518 = vrcp.f32 %v394_v18 }
 0x30e   :  { %v519_v19 = vpop.eup %518 }
 0x30f   :  { %v396_v20 = vmul.f32 %v519_v19, %v517_v11 }
 0x311   :  { %397 = vst [vmem:[#allocation2] sm:$0xf] %v396_v20 }
 0x312   :  { %531 = shalt.err (!%p528_p4)
}
 0x313   :  { %s532_s20 = scalar_lea.hbm %s694_s7, 64 }
 0x314   :  { %p533_p5 = scmp.ne.s32.totalorder %s694_s7, %s532_s20  ;;  %p536_p6 = scmp.lt.u32.totalorder %s532_s20, %s694_s7 }
 0x316   :  { %p538_p7 = pnand %p536_p6, %p533_p5 }
 0x318   :  { %541 = shalt.err (!%p538_p7)
}
 0x319   :  { %407 = dma.vmem_to_hbm [thread:$0]  %s405_s5, 64, %s694_s7, [#allocation3]  }
 0x31a   :  { %542 = dma.done.wait [#allocation3], 64  }
 0x31b   :  { %543 = vsyncadd [#allocation3], 4294967232 }
 0x31c   :  { %411 = vsyncpa [#allocation3], 1 }

</bundles_post_ra>
